<compile_context>
chip_gen: v7x
topology: tpu7x:2x2x1
jax: 0.10.0
libtpu: 0.0.40
codegen_flags: <defaults>
</compile_context>

<pallas_src>
import jax
import jax.numpy as jnp
from jax import lax
from jax.experimental import pallas as pl
from jax.experimental.pallas import tpu as pltpu


# ---- module config (deterministic, set in-script) --------------------------
NUM_CLASSES = 4
TIME_AGG = "mean"        # only "mean" implemented in-kernel
MAX_TIME_DELTA = None
LOG_AMOUNT = False
# TODO(synk): time_aggregation == "median" (prefix_medians) has no clean
#             vectorized Pallas equivalent; only "mean" is implemented.

# ---- tiling knobs -----------------------------------------------------------
BATCH_TILE = 128         # sequences per grid step (multiple of 8)
LANE_TILE = 256          # sequence-chunk width (lanes), multiple of 128


def _round_up(x, m):
    return ((x + m - 1) // m) * m


def history_density_kernel(ts_ref, lab_ref, amt_ref, inv_ar_ref, out_ref,
                           tri_ref, lhs_ref, run_ref, ts0_ref, tslast_ref):
    # Block shapes (one batch tile x one sequence chunk):
    #   ts/lab/amt   : (Bt, Lt)
    #   inv_ar_ref   : (1, Lt)       precomputed 1/arange row for chunk j
    #   out_ref      : (R, Bt, Lt)   R = 2*C + 1, feature-major
    #   tri_ref      : (Lt, Lt)      bf16 upper-triangular mask (scratch)
    #   lhs_ref      : (R*Bt, Lt)    f32 fused LHS scratch
    #   run_ref      : (R*Bt, 1)     running prefix sums carried across chunks
    #   ts0_ref      : (Bt, 1)       first timestamp of each sequence
    #   tslast_ref   : (Bt, 1)       last timestamp of the previous chunk
    bt, lt = ts_ref.shape
    C = NUM_CLASSES
    j = pl.program_id(1)

    ts = ts_ref[...]
    lab = lab_ref[...]
    amt = amt_ref[...]

    # (Re)initialize carried state at the first chunk of every batch tile.
    @pl.when(j == 0)
    def _():
        rows = lax.broadcasted_iota(jnp.int32, (lt, lt), 0)
        cols = lax.broadcasted_iota(jnp.int32, (lt, lt), 1)
        # cumsum(x)[q] = (x @ U)[q] with U[p, q] = (p <= q); 0/1 exact in bf16.
        tri_ref[...] = (rows <= cols).astype(jnp.float32).astype(jnp.bfloat16)
        run_ref[...] = jnp.zeros_like(run_ref)
        ts0_ref[...] = ts[:, 0:1]
        tslast_ref[...] = ts[:, 0:1]   # value unused: pos-0 delta forced to 0

    lpos = lax.broadcasted_iota(jnp.int32, (bt, lt), 1)
    gpos = lpos + j * lt               # global sequence positions of the chunk

    # offsets[0] = ts[0]; offsets[p>0] = ts[p] - ts[0]; clipped from below.
    min_off = 1e-6 * (1.0 if MAX_TIME_DELTA is None else MAX_TIME_DELTA)
    offsets = jnp.where(gpos == 0, ts, ts - ts0_ref[...])
    offsets = jnp.maximum(offsets, jnp.float32(min_off))
    inv_off = 1.0 / offsets            # exact divide, shared by all 2C rows

    # deltas[0] = 0; deltas[p>0] = ts[p] - ts[p-1] (previous chunk carried).
    ts_prev = jnp.concatenate([tslast_ref[...], ts[:, :lt - 1]], axis=1)
    deltas = jnp.where(gpos == 0, jnp.float32(0.0), ts - ts_prev)
    if MAX_TIME_DELTA is not None:
        deltas = jnp.minimum(deltas, jnp.float32(MAX_TIME_DELTA))

    amt_eff = jnp.expm1(amt) if LOG_AMOUNT else amt   # expm1: no cancellation

    # Fused LHS, written group-by-group into VMEM scratch (no concatenate):
    #   rows [0:bt)                     deltas
    #   rows [(1+c)*bt:(2+c)*bt)        one_hot(label == c)
    #   rows [(1+C+c)*bt:(2+C+c)*bt)    amount * one_hot(label == c)
    lhs_ref[0:bt, :] = deltas
    for c in range(C):
        oh = (lab == c).astype(jnp.float32)
        lhs_ref[(1 + c) * bt:(2 + c) * bt, :] = oh
        lhs_ref[(1 + C + c) * bt:(2 + C + c) * bt, :] = oh * amt_eff

    # f32-accurate prefix sums with two bf16 MXU passes: hi/lo split of the
    # LHS against the exact bf16 0/1 mask.  (Default single-pass bf16 would
    # inject ~2^-9 relative error into the carried running sums; HIGHEST
    # precision would cost ~6x MXU passes.)
    lhs = lhs_ref[...]
    lhs_hi = lhs.astype(jnp.bfloat16)
    lhs_lo = (lhs - lhs_hi.astype(jnp.float32)).astype(jnp.bfloat16)
    tri = tri_ref[...]
    cums = (run_ref[...]
            + jnp.dot(lhs_hi, tri, preferred_element_type=jnp.float32)
            + jnp.dot(lhs_lo, tri, preferred_element_type=jnp.float32))

    # Carry state to the next chunk of this batch tile.
    run_ref[...] = cums[:, lt - 1:lt]
    tslast_ref[...] = ts[:, lt - 1:lt]

    # Lane-dense stores: agg_deltas scaled by the precomputed 1/arange row,
    # then all 2C density groups in one broadcast store.
    out_ref[0] = cums[0:bt, :] * inv_ar_ref[...]
    out_ref[1:, :, :] = (cums[bt:, :].reshape(2 * C, bt, lt)
                         * inv_off[None, :, :])


def _history_density_padded(timestamps, labels, amounts):
    """Pallas launch. Returns feature-major, padded (R, Bp, Lp) densities."""
    b, l = timestamps.shape
    C = NUM_CLASSES
    R = 2 * C + 1

    lt = min(LANE_TILE, _round_up(l, 128))     # lane chunk (multiple of 128)
    lp = _round_up(l, lt)                      # padded sequence length
    bt = min(BATCH_TILE, _round_up(b, 8))      # batch tile (multiple of 8)
    bp = _round_up(b, bt)                      # padded batch
    # Keep >= 2 batch tiles (when it costs no extra padding) so the "parallel"
    # axis can shard across both v7x TensorCores; v5e/v6e are single-TC.
    if bp // bt < 2 and bp >= 16 and (bp // 2) % 8 == 0:
        bt = bp // 2
    nb, nc = bp // bt, lp // lt

    ts = timestamps.astype(jnp.float32)
    lab = labels.astype(jnp.int32)
    amt = amounts.astype(jnp.float32)
    if (bp, lp) != (b, l):                     # skip the pad pass when aligned
        pad = ((0, bp - b), (0, lp - l))
        ts, lab, amt = jnp.pad(ts, pad), jnp.pad(lab, pad), jnp.pad(amt, pad)

    inv_ar = (1.0 / jnp.arange(1, lp + 1, dtype=jnp.float32)).reshape(1, lp)

    # Explicit VMEM budget for the chosen tiles (v7x: 64 MiB physical/TC).
    vmem_bytes = (lt * lt * 2                    # bf16 triangular mask scratch
                  + R * bt * lt * 4              # f32 fused-LHS scratch
                  + 2 * 3 * bt * lt * 4          # double-buffered inputs
                  + 2 * 8 * lt * 4               # double-buffered 1/arange row
                  + 2 * R * bt * lt * 4          # double-buffered output
                  + 8 * R * bt * lt * 4          # transients (cums, hi/lo, ...)
                  + (R * bt + 2 * bt + 8) * 128 * 4)  # lane-padded carries
    vmem_limit = int(min(64 << 20, max(32 << 20, 3 * vmem_bytes // 2)))

    return pl.pallas_call(
        history_density_kernel,
        out_shape=jax.ShapeDtypeStruct((R, bp, lp), jnp.float32),
        grid=(nb, nc),
        in_specs=[
            pl.BlockSpec((bt, lt), lambda i, j: (i, j)),   # timestamps
            pl.BlockSpec((bt, lt), lambda i, j: (i, j)),   # labels
            pl.BlockSpec((bt, lt), lambda i, j: (i, j)),   # amounts
            pl.BlockSpec((1, lt), lambda i, j: (0, j)),    # 1/arange row
        ],
        out_specs=pl.BlockSpec((R, bt, lt), lambda i, j: (0, i, j)),
        scratch_shapes=[
            pltpu.VMEM((lt, lt), jnp.bfloat16),     # triangular ones mask
            pltpu.VMEM((R * bt, lt), jnp.float32),  # fused LHS
            pltpu.VMEM((R * bt, 1), jnp.float32),   # running prefix sums
            pltpu.VMEM((bt, 1), jnp.float32),       # first timestamp
            pltpu.VMEM((bt, 1), jnp.float32),       # last ts of prev chunk
        ],
        compiler_params=pltpu.CompilerParams(
            dimension_semantics=("parallel", "arbitrary"),
            vmem_limit_bytes=vmem_limit),
    )(ts, lab, amt, inv_ar)                     # (R, Bp, Lp) feature-major


@jax.jit
def history_density_features(timestamps, labels, amounts):
    """Feature-major (1+2C, B, L) densities — the layout to consume downstream
    (avoids the extra HBM relayout pass of the (B, L, H) API wrapper)."""
    b, l = timestamps.shape
    return _history_density_padded(timestamps, labels, amounts)[:, :b, :l]


@jax.jit
def history_density_encoder(timestamps, labels, amounts):
    """API-compat wrapper matching the PyTorch forward:
    returns (hiddens (B, L, 1+2C), states (1, B, L, 1+2C)).

    NOTE: the (R, B, L) -> (B, L, R) relayout below is an extra HBM
    read+write pass of the output; prefer history_density_features."""
    b, l = timestamps.shape
    out = _history_density_padded(timestamps, labels, amounts)
    hiddens = jnp.transpose(out[:, :b, :l], (1, 2, 0))
    return hiddens, hiddens[None]


def _reference(ts, lab, amt, C):
    """Pure-JAX reference mirroring the PyTorch forward (mean aggregation)."""
    b, l = ts.shape
    idx = jnp.arange(l)[None, :]
    min_off = 1e-6 * (1.0 if MAX_TIME_DELTA is None else MAX_TIME_DELTA)
    offsets = jnp.where(idx == 0, ts, ts - ts[:, :1])
    offsets = jnp.maximum(offsets, min_off)
    deltas = jnp.concatenate(
        [jnp.zeros((b, 1), ts.dtype), ts[:, 1:] - ts[:, :-1]], axis=1)
    if MAX_TIME_DELTA is not None:
        deltas = jnp.minimum(deltas, MAX_TIME_DELTA)
    arange = jnp.arange(1, l + 1, dtype=ts.dtype)
    onehot = jax.nn.one_hot(lab, C, dtype=ts.dtype)
    amt_eff = jnp.expm1(amt) if LOG_AMOUNT else amt
    agg = jnp.cumsum(deltas, axis=1) / arange[None]
    lab_dens = jnp.cumsum(onehot, axis=1) / offsets[..., None]
    amt_dens = jnp.cumsum(amt_eff[..., None] * onehot, axis=1) / offsets[..., None]
    return jnp.concatenate([agg[..., None], lab_dens, amt_dens], axis=-1)


if __name__ == "__main__":
    C = NUM_CLASSES

    def make_inputs(key, b, l):
        k_t, k_l, k_a = jax.random.split(key, 3)
        gaps = jax.random.uniform(k_t, (b, l), jnp.float32, minval=0.1, maxval=2.0)
        timestamps = jnp.cumsum(gaps, axis=1)      # monotonically increasing
        labels = jax.random.randint(k_l, (b, l), 0, C, dtype=jnp.int32)
        amounts = jax.random.uniform(k_a, (b, l), jnp.float32, minval=0.0, maxval=5.0)
        return timestamps, labels, amounts

    # Small demo shape (B=2, L=8): one batch tile, one lane chunk.
    ts, lab, amt = make_inputs(jax.random.PRNGKey(0), 2, 8)
    hiddens, states = history_density_encoder(ts, lab, amt)
    hiddens = jax.block_until_ready(hiddens)
    states = jax.block_until_ready(states)
    assert hiddens.shape == (2, 8, 1 + 2 * C)
    assert states.shape == (1, 2, 8, 1 + 2 * C)
    ref = _reference(ts, lab, amt, C)
    assert jnp.allclose(hiddens, ref, atol=1e-4, rtol=1e-4), (
        f"max abs err {jnp.max(jnp.abs(hiddens - ref))}")

    # Larger shape exercising batch tiling (nb=2), lane chunking (nc=2) with
    # carried running sums, and padding of both axes.
    ts2, lab2, amt2 = make_inputs(jax.random.PRNGKey(1), 200, 300)
    hiddens2, _ = history_density_encoder(ts2, lab2, amt2)
    hiddens2 = jax.block_until_ready(hiddens2)
    ref2 = _reference(ts2, lab2, amt2, C)
    assert jnp.allclose(hiddens2, ref2, atol=1e-3, rtol=1e-3), (
        f"max abs err {jnp.max(jnp.abs(hiddens2 - ref2))}")

    print("KERNEL_OK")
</pallas_src>

<mosaic_0001>
module attributes {stable_mosaic.version = 11 : i64} {
  func.func @history_density_kernel(%arg0: i32, %arg1: i32, %arg2: memref<8x128xf32, #tpu.memory_space<vmem>>, %arg3: memref<8x128xi32, #tpu.memory_space<vmem>>, %arg4: memref<8x128xf32, #tpu.memory_space<vmem>>, %arg5: memref<1x128xf32, #tpu.memory_space<vmem>>, %arg6: memref<9x8x128xf32, #tpu.memory_space<vmem>>, %arg7: memref<128x128xbf16, #tpu.memory_space<vmem>>, %arg8: memref<72x128xf32, #tpu.memory_space<vmem>>, %arg9: memref<72x1xf32, #tpu.memory_space<vmem>>, %arg10: memref<8x1xf32, #tpu.memory_space<vmem>>, %arg11: memref<8x1xf32, #tpu.memory_space<vmem>>) attributes {dimension_semantics = [#tpu.dimension_semantics<parallel>, #tpu.dimension_semantics<arbitrary>], iteration_bounds = array<i64: 1, 1>, scalar_prefetch = 0 : i64, scratch_operands = 5 : i64, tpu.core_type = #tpu.core_type<tc>, window_params = [{transform_indices = @transform_0, window_bounds = array<i64: 8, 128>}, {transform_indices = @transform_1, window_bounds = array<i64: 8, 128>}, {transform_indices = @transform_2, window_bounds = array<i64: 8, 128>}, {transform_indices = @transform_3, window_bounds = array<i64: 1, 128>}, {transform_indices = @transform_4, window_bounds = array<i64: 9, 8, 128>}]} {
    %c0 = arith.constant 0 : index
    %c0_0 = arith.constant 0 : index
    %0 = vector.load %arg2[%c0, %c0_0] : memref<8x128xf32, #tpu.memory_space<vmem>>, vector<8x128xf32>
    %c0_1 = arith.constant 0 : index
    %c0_2 = arith.constant 0 : index
    %1 = vector.load %arg3[%c0_1, %c0_2] : memref<8x128xi32, #tpu.memory_space<vmem>>, vector<8x128xi32>
    %c0_3 = arith.constant 0 : index
    %c0_4 = arith.constant 0 : index
    %2 = vector.load %arg4[%c0_3, %c0_4] : memref<8x128xf32, #tpu.memory_space<vmem>>, vector<8x128xf32>
    %c0_i32 = arith.constant 0 : i32
    %3 = arith.cmpi eq, %arg1, %c0_i32 : i32
    %4 = arith.extui %3 : i1 to i32
    %c0_i32_5 = arith.constant 0 : i32
    %5 = arith.cmpi ne, %4, %c0_i32_5 : i32
    scf.if %5 {
      %86 = tpu.iota {dimensions = array<i32: 0>} : vector<128x128xi32>
      %87 = tpu.iota {dimensions = array<i32: 1>} : vector<128x128xi32>
      %88 = arith.cmpi sle, %86, %87 : vector<128x128xi32>
      %89 = arith.extui %88 : vector<128x128xi1> to vector<128x128xi32>
      %90 = arith.sitofp %89 : vector<128x128xi32> to vector<128x128xf32>
      %91 = arith.truncf %90 : vector<128x128xf32> to vector<128x128xbf16>
      %c0_44 = arith.constant 0 : index
      %c0_45 = arith.constant 0 : index
      %92 = vector.load %arg7[%c0_44, %c0_45] : memref<128x128xbf16, #tpu.memory_space<vmem>>, vector<128x128xbf16>
      tpu.vector_store %arg7[%c0_44, %c0_45], %91 {strides = array<i32>} : memref<128x128xbf16, #tpu.memory_space<vmem>>, vector<128x128xbf16>,
      %cst_46 = arith.constant 0.000000e+00 : f32
      %93 = vector.broadcast %cst_46 : f32 to vector<72x1xf32>
      %c0_47 = arith.constant 0 : index
      %c0_48 = arith.constant 0 : index
      %94 = vector.load %arg9[%c0_47, %c0_48] : memref<72x1xf32, #tpu.memory_space<vmem>>, vector<72x1xf32>
      tpu.vector_store %arg9[%c0_47, %c0_48], %93 {strides = array<i32>} : memref<72x1xf32, #tpu.memory_space<vmem>>, vector<72x1xf32>,
      %95 = vector.extract_strided_slice %0 {offsets = [0, 0], sizes = [8, 1], strides = [1, 1]} : vector<8x128xf32> to vector<8x1xf32>
      %c0_49 = arith.constant 0 : index
      %c0_50 = arith.constant 0 : index
      %96 = vector.load %arg10[%c0_49, %c0_50] : memref<8x1xf32, #tpu.memory_space<vmem>>, vector<8x1xf32>
      tpu.vector_store %arg10[%c0_49, %c0_50], %95 {strides = array<i32>} : memref<8x1xf32, #tpu.memory_space<vmem>>, vector<8x1xf32>,
      %97 = vector.extract_strided_slice %0 {offsets = [0, 0], sizes = [8, 1], strides = [1, 1]} : vector<8x128xf32> to vector<8x1xf32>
      %c0_51 = arith.constant 0 : index
      %c0_52 = arith.constant 0 : index
      %98 = vector.load %arg11[%c0_51, %c0_52] : memref<8x1xf32, #tpu.memory_space<vmem>>, vector<8x1xf32>
      tpu.vector_store %arg11[%c0_51, %c0_52], %97 {strides = array<i32>} : memref<8x1xf32, #tpu.memory_space<vmem>>, vector<8x1xf32>,
    } else {
    }
    %6 = tpu.iota {dimensions = array<i32: 1>} : vector<8x128xi32>
    %c128_i32 = arith.constant 128 : i32
    %7 = arith.muli %arg1, %c128_i32 : i32
    %8 = vector.broadcast %7 : i32 to vector<8x128xi32>
    %9 = arith.addi %6, %8 : vector<8x128xi32>
    %c0_i32_6 = arith.constant 0 : i32
    %10 = vector.broadcast %c0_i32_6 : i32 to vector<8x128xi32>
    %11 = arith.cmpi eq, %9, %10 : vector<8x128xi32>
    %c0_7 = arith.constant 0 : index
    %c0_8 = arith.constant 0 : index
    %12 = vector.load %arg10[%c0_7, %c0_8] : memref<8x1xf32, #tpu.memory_space<vmem>>, vector<8x1xf32>
    %13 = vector.broadcast %12 : vector<8x1xf32> to vector<8x128xf32>
    %14 = arith.subf %0, %13 : vector<8x128xf32>
    %15 = arith.select %11, %0, %14 : vector<8x128xi1>, vector<8x128xf32>
    %cst = arith.constant 9.99999997E-7 : f32
    %16 = vector.broadcast %cst : f32 to vector<8x128xf32>
    %17 = arith.maximumf %15, %16 : vector<8x128xf32>
    %cst_9 = arith.constant 1.000000e+00 : f32
    %18 = vector.broadcast %cst_9 : f32 to vector<8x128xf32>
    %19 = arith.divf %18, %17 : vector<8x128xf32>
    %c0_10 = arith.constant 0 : index
    %c0_11 = arith.constant 0 : index
    %20 = vector.load %arg11[%c0_10, %c0_11] : memref<8x1xf32, #tpu.memory_space<vmem>>, vector<8x1xf32>
    %21 = vector.extract_strided_slice %0 {offsets = [0, 0], sizes = [8, 127], strides = [1, 1]} : vector<8x128xf32> to vector<8x127xf32>
    %22 = tpu.concatenate %20, %21 in 1 : vector<8x1xf32>, vector<8x127xf32> -> vector<8x128xf32>
    %c0_i32_12 = arith.constant 0 : i32
    %23 = vector.broadcast %c0_i32_12 : i32 to vector<8x128xi32>
    %24 = arith.cmpi eq, %9, %23 : vector<8x128xi32>
    %25 = arith.subf %0, %22 : vector<8x128xf32>
    %cst_13 = arith.constant 0.000000e+00 : f32
    %26 = vector.broadcast %cst_13 : f32 to vector<8x128xf32>
    %27 = arith.select %24, %26, %25 : vector<8x128xi1>, vector<8x128xf32>
    %c0_14 = arith.constant 0 : index
    %c0_15 = arith.constant 0 : index
    %28 = vector.load %arg8[%c0_14, %c0_15] : memref<72x128xf32, #tpu.memory_space<vmem>>, vector<8x128xf32>
    tpu.vector_store %arg8[%c0_14, %c0_15], %27 {strides = array<i32>} : memref<72x128xf32, #tpu.memory_space<vmem>>, vector<8x128xf32>,
    %c0_i32_16 = arith.constant 0 : i32
    %29 = vector.broadcast %c0_i32_16 : i32 to vector<8x128xi32>
    %30 = arith.cmpi eq, %1, %29 : vector<8x128xi32>
    %31 = arith.extui %30 : vector<8x128xi1> to vector<8x128xi32>
    %32 = arith.sitofp %31 : vector<8x128xi32> to vector<8x128xf32>
    %c8 = arith.constant 8 : index
    %c0_17 = arith.constant 0 : index
    %33 = vector.load %arg8[%c8, %c0_17] : memref<72x128xf32, #tpu.memory_space<vmem>>, vector<8x128xf32>
    tpu.vector_store %arg8[%c8, %c0_17], %32 {strides = array<i32>} : memref<72x128xf32, #tpu.memory_space<vmem>>, vector<8x128xf32>,
    %34 = arith.mulf %32, %2 : vector<8x128xf32>
    %c40 = arith.constant 40 : index
    %c0_18 = arith.constant 0 : index
    %35 = vector.load %arg8[%c40, %c0_18] : memref<72x128xf32, #tpu.memory_space<vmem>>, vector<8x128xf32>
    tpu.vector_store %arg8[%c40, %c0_18], %34 {strides = array<i32>} : memref<72x128xf32, #tpu.memory_space<vmem>>, vector<8x128xf32>,
    %c1_i32 = arith.constant 1 : i32
    %36 = vector.broadcast %c1_i32 : i32 to vector<8x128xi32>
    %37 = arith.cmpi eq, %1, %36 : vector<8x128xi32>
    %38 = arith.extui %37 : vector<8x128xi1> to vector<8x128xi32>
    %39 = arith.sitofp %38 : vector<8x128xi32> to vector<8x128xf32>
    %c16 = arith.constant 16 : index
    %c0_19 = arith.constant 0 : index
    %40 = vector.load %arg8[%c16, %c0_19] : memref<72x128xf32, #tpu.memory_space<vmem>>, vector<8x128xf32>
    tpu.vector_store %arg8[%c16, %c0_19], %39 {strides = array<i32>} : memref<72x128xf32, #tpu.memory_space<vmem>>, vector<8x128xf32>,
    %41 = arith.mulf %39, %2 : vector<8x128xf32>
    %c48 = arith.constant 48 : index
    %c0_20 = arith.constant 0 : index
    %42 = vector.load %arg8[%c48, %c0_20] : memref<72x128xf32, #tpu.memory_space<vmem>>, vector<8x128xf32>
    tpu.vector_store %arg8[%c48, %c0_20], %41 {strides = array<i32>} : memref<72x128xf32, #tpu.memory_space<vmem>>, vector<8x128xf32>,
    %c2_i32 = arith.constant 2 : i32
    %43 = vector.broadcast %c2_i32 : i32 to vector<8x128xi32>
    %44 = arith.cmpi eq, %1, %43 : vector<8x128xi32>
    %45 = arith.extui %44 : vector<8x128xi1> to vector<8x128xi32>
    %46 = arith.sitofp %45 : vector<8x128xi32> to vector<8x128xf32>
    %c24 = arith.constant 24 : index
    %c0_21 = arith.constant 0 : index
    %47 = vector.load %arg8[%c24, %c0_21] : memref<72x128xf32, #tpu.memory_space<vmem>>, vector<8x128xf32>
    tpu.vector_store %arg8[%c24, %c0_21], %46 {strides = array<i32>} : memref<72x128xf32, #tpu.memory_space<vmem>>, vector<8x128xf32>,
    %48 = arith.mulf %46, %2 : vector<8x128xf32>
    %c56 = arith.constant 56 : index
    %c0_22 = arith.constant 0 : index
    %49 = vector.load %arg8[%c56, %c0_22] : memref<72x128xf32, #tpu.memory_space<vmem>>, vector<8x128xf32>
    tpu.vector_store %arg8[%c56, %c0_22], %48 {strides = array<i32>} : memref<72x128xf32, #tpu.memory_space<vmem>>, vector<8x128xf32>,
    %c3_i32 = arith.constant 3 : i32
    %50 = vector.broadcast %c3_i32 : i32 to vector<8x128xi32>
    %51 = arith.cmpi eq, %1, %50 : vector<8x128xi32>
    %52 = arith.extui %51 : vector<8x128xi1> to vector<8x128xi32>
    %53 = arith.sitofp %52 : vector<8x128xi32> to vector<8x128xf32>
    %c32 = arith.constant 32 : index
    %c0_23 = arith.constant 0 : index
    %54 = vector.load %arg8[%c32, %c0_23] : memref<72x128xf32, #tpu.memory_space<vmem>>, vector<8x128xf32>
    tpu.vector_store %arg8[%c32, %c0_23], %53 {strides = array<i32>} : memref<72x128xf32, #tpu.memory_space<vmem>>, vector<8x128xf32>,
    %55 = arith.mulf %53, %2 : vector<8x128xf32>
    %c64 = arith.constant 64 : index
    %c0_24 = arith.constant 0 : index
    %56 = vector.load %arg8[%c64, %c0_24] : memref<72x128xf32, #tpu.memory_space<vmem>>, vector<8x128xf32>
    tpu.vector_store %arg8[%c64, %c0_24], %55 {strides = array<i32>} : memref<72x128xf32, #tpu.memory_space<vmem>>, vector<8x128xf32>,
    %c0_25 = arith.constant 0 : index
    %c0_26 = arith.constant 0 : index
    %57 = vector.load %arg8[%c0_25, %c0_26] : memref<72x128xf32, #tpu.memory_space<vmem>>, vector<72x128xf32>
    %58 = arith.truncf %57 : vector<72x128xf32> to vector<72x128xbf16>
    %59 = arith.extf %58 : vector<72x128xbf16> to vector<72x128xf32>
    %60 = arith.subf %57, %59 : vector<72x128xf32>
    %61 = arith.truncf %60 : vector<72x128xf32> to vector<72x128xbf16>
    %c0_27 = arith.constant 0 : index
    %c0_28 = arith.constant 0 : index
    %62 = vector.load %arg7[%c0_27, %c0_28] : memref<128x128xbf16, #tpu.memory_space<vmem>>, vector<128x128xbf16>
    %c0_29 = arith.constant 0 : index
    %c0_30 = arith.constant 0 : index
    %63 = vector.load %arg9[%c0_29, %c0_30] : memref<72x1xf32, #tpu.memory_space<vmem>>, vector<72x1xf32>
    %cst_31 = arith.constant dense<0.000000e+00> : vector<72x128xf32>
    %64 = tpu.matmul %58, %62, %cst_31 {dimension_numbers = #tpu.dot_dimension_numbers<[1], [0], [0], [1], [0, 0, 1, 1], [], []>} : vector<72x128xbf16>, vector<128x128xbf16>, vector<72x128xf32> -> vector<72x128xf32>
    %65 = vector.broadcast %63 : vector<72x1xf32> to vector<72x128xf32>
    %66 = arith.addf %65, %64 : vector<72x128xf32>
    %cst_32 = arith.constant dense<0.000000e+00> : vector<72x128xf32>
    %67 = tpu.matmul %61, %62, %cst_32 {dimension_numbers = #tpu.dot_dimension_numbers<[1], [0], [0], [1], [0, 0, 1, 1], [], []>} : vector<72x128xbf16>, vector<128x128xbf16>, vector<72x128xf32> -> vector<72x128xf32>
    %68 = arith.addf %66, %67 : vector<72x128xf32>
    %69 = vector.extract_strided_slice %68 {offsets = [0, 127], sizes = [72, 1], strides = [1, 1]} : vector<72x128xf32> to vector<72x1xf32>
    %c0_33 = arith.constant 0 : index
    %c0_34 = arith.constant 0 : index
    %70 = vector.load %arg9[%c0_33, %c0_34] : memref<72x1xf32, #tpu.memory_space<vmem>>, vector<72x1xf32>
    tpu.vector_store %arg9[%c0_33, %c0_34], %69 {strides = array<i32>} : memref<72x1xf32, #tpu.memory_space<vmem>>, vector<72x1xf32>,
    %71 = vector.extract_strided_slice %0 {offsets = [0, 127], sizes = [8, 1], strides = [1, 1]} : vector<8x128xf32> to vector<8x1xf32>
    %c0_35 = arith.constant 0 : index
    %c0_36 = arith.constant 0 : index
    %72 = vector.load %arg11[%c0_35, %c0_36] : memref<8x1xf32, #tpu.memory_space<vmem>>, vector<8x1xf32>
    tpu.vector_store %arg11[%c0_35, %c0_36], %71 {strides = array<i32>} : memref<8x1xf32, #tpu.memory_space<vmem>>, vector<8x1xf32>,
    %73 = vector.extract_strided_slice %68 {offsets = [0, 0], sizes = [8, 128], strides = [1, 1]} : vector<72x128xf32> to vector<8x128xf32>
    %c0_37 = arith.constant 0 : index
    %c0_38 = arith.constant 0 : index
    %74 = vector.load %arg5[%c0_37, %c0_38] : memref<1x128xf32, #tpu.memory_space<vmem>>, vector<1x128xf32>
    %75 = vector.broadcast %74 : vector<1x128xf32> to vector<8x128xf32>
    %76 = arith.mulf %73, %75 : vector<8x128xf32>
    %c0_39 = arith.constant 0 : index
    %c0_40 = arith.constant 0 : index
    %c0_41 = arith.constant 0 : index
    %77 = vector.load %arg6[%c0_39, %c0_40, %c0_41] : memref<9x8x128xf32, #tpu.memory_space<vmem>>, vector<1x8x128xf32>
    %78 = vector.shape_cast %77 : vector<1x8x128xf32> to vector<8x128xf32>
    %79 = vector.shape_cast %76 : vector<8x128xf32> to vector<1x8x128xf32>
    tpu.vector_store %arg6[%c0_39, %c0_40, %c0_41], %79 {strides = array<i32>} : memref<9x8x128xf32, #tpu.memory_space<vmem>>, vector<1x8x128xf32>,
    %80 = vector.extract_strided_slice %68 {offsets = [8, 0], sizes = [64, 128], strides = [1, 1]} : vector<72x128xf32> to vector<64x128xf32>
    %81 = vector.shape_cast %80 : vector<64x128xf32> to vector<8x8x128xf32>
    %82 = vector.shape_cast %19 : vector<8x128xf32> to vector<1x8x128xf32>
    %83 = vector.broadcast %82 : vector<1x8x128xf32> to vector<8x8x128xf32>
    %84 = arith.mulf %81, %83 : vector<8x8x128xf32>
    %c1 = arith.constant 1 : index
    %c0_42 = arith.constant 0 : index
    %c0_43 = arith.constant 0 : index
    %85 = vector.load %arg6[%c1, %c0_42, %c0_43] : memref<9x8x128xf32, #tpu.memory_space<vmem>>, vector<8x8x128xf32>
    tpu.vector_store %arg6[%c1, %c0_42, %c0_43], %84 {strides = array<i32>} : memref<9x8x128xf32, #tpu.memory_space<vmem>>, vector<8x8x128xf32>,
    return
  }
  func.func @transform_0(%arg0: i32, %arg1: i32) -> (i32, i32) {
    %c0_i32 = arith.constant 0 : i32
    return %arg0, %arg1 : i32, i32
  }
  func.func @transform_1(%arg0: i32, %arg1: i32) -> (i32, i32) {
    %c0_i32 = arith.constant 0 : i32
    return %arg0, %arg1 : i32, i32
  }
  func.func @transform_2(%arg0: i32, %arg1: i32) -> (i32, i32) {
    %c0_i32 = arith.constant 0 : i32
    return %arg0, %arg1 : i32, i32
  }
  func.func @transform_3(%arg0: i32, %arg1: i32) -> (i32, i32) {
    %c0_i32 = arith.constant 0 : i32
    %c0_i32_0 = arith.constant 0 : i32
    return %c0_i32, %arg1 : i32, i32
  }
  func.func @transform_4(%arg0: i32, %arg1: i32) -> (i32, i32, i32) {
    %c0_i32 = arith.constant 0 : i32
    %c0_i32_0 = arith.constant 0 : i32
    return %c0_i32, %arg0, %arg1 : i32, i32, i32
  }
}

</mosaic_0001>

<bundles_post_ra>
// kernel: history_density_encoder.1
= control target key start
LH: loop header
LB: loop body
LE: loop exit
PB: predicated region body
PF: predicated region fallthrough
CT: control target
= control target key end

     0   :  { %vm108_vm0 = vcmask 7168   ;;  %v25_v0 = vlaneseq  ;;  %v705_v2 = vmov 0.0   ;;  %vm707_vm1 = vmmov 0   ;;  %s922_s0 = inlined_call_operand.vmem [shape: f32[8,128], index: 0, kind: input, shape index: {}]   ;;  %s923_s1 = inlined_call_operand.vmem [shape: s32[8,128], index: 1, kind: input, shape index: {}]   ;;  %s924_s2 = inlined_call_operand.vmem [shape: f32[8,128], index: 2, kind: input, shape index: {}]   ;;  %s925_s3 = inlined_call_operand.vmem [shape: f32[1,128], index: 3, kind: input, shape index: {}]   ;;  %s926_s4 = inlined_call_operand.vmem [shape: f32[9,8,128], index: 4, kind: output, shape index: {}]  }
   0x1   :  { %v740_v1 = vld [vmem:[%s922_s0] sm:$0xff]  ;;  %604 = vmatprep.subr.bf16.mxu1 %v705_v2  ;;  %109 = vst.msk [vmem:[#allocation4] sm:$0xff] %vm108_vm0, %v705_v2  ;;  %110 = vst.msk [vmem:[#allocation4 + $0x8] sm:$0xff] %vm108_vm0, %v705_v2  ;;  %640 = vmatprep.subr.bf16.mxu0 %v705_v2  ;;  %s706_s0 = smov 1   ;;  %v708_v10 = vmov 1.0|1.0  }
   0x2   :  { %111 = vst.msk [vmem:[#allocation4 + $0x10] sm:$0xff] %vm108_vm0, %v705_v2  ;;  %112 = vst.msk [vmem:[#allocation4 + $0x18] sm:$0xff] %vm108_vm0, %v705_v2  ;;  %139 = vrot.lane.b32.xlu0 %v740_v1, %s706_s0  ;;  %v26_v3 = vshrl.u32 %v25_v0, 7  ;;  %v768_v4 = vand.u32 127, %v25_v0  ;;  %620 = vmatprep.mubr.msk.bf16.mxu1 %vm707_vm1, %v705_v2  ;;  %v709_v22 = vmov 0   ;;  %v19_v32 = vld [vmem:[%s923_s1] sm:$0xff] }
   0x3   :  { %113 = vst.msk [vmem:[#allocation4 + $0x20] sm:$0xff] %vm108_vm0, %v705_v2  ;;  %114 = vst.msk [vmem:[#allocation4 + $0x28] sm:$0xff] %vm108_vm0, %v705_v2  ;;  %656 = vmatprep.mubr.msk.bf16.mxu0 %vm707_vm1, %v705_v2  ;;  %702 = vset.pattern.permute.xlu1 %v709_v22  ;;  %v710_v39 = vmov 1.0   ;;  %v20_v42 = vld [vmem:[%s924_s2] sm:$0xff] }
   0x4   :  { %115 = vst.msk [vmem:[#allocation4 + $0x30] sm:$0xff] %vm108_vm0, %v705_v2  ;;  %116 = vst.msk [vmem:[#allocation4 + $0x38] sm:$0xff] %vm108_vm0, %v705_v2  ;;  %v27_v5 = vadd.s32 8, %v26_v3  ;;  %vm44_vm2 = vcmp.le.s32.totalorder %v26_v3, %v768_v4  ;;  %v28_v6 = vadd.s32 16, %v26_v3  ;;  %v29_v7 = vadd.s32 24, %v26_v3  ;;  %701 = vset.pattern.permute.xlu0 %v709_v22 }
   0x5   :  { %117 = vst.msk [vmem:[#allocation4 + $0x40] sm:$0xff] %vm108_vm0, %v705_v2  ;;  %118 = vst.msk [vmem:[#allocation5] sm:$0xff] %vm108_vm0, %v740_v1  ;;  %v30_v8 = vadd.s32 32, %v26_v3  ;;  %v31_v9 = vadd.s32 40, %v26_v3  ;;  %v32_v11 = vadd.s32 48, %v26_v3  ;;  %v33_v12 = vadd.s32 56, %v26_v3 }
   0x6   :  { %119 = vst.msk [vmem:[#allocation6] sm:$0xff] %vm108_vm0, %v740_v1  ;;  %vm45_vm3 = vcmp.le.s32.totalorder %v27_v5, %v768_v4  ;;  %vm46_vm4 = vcmp.le.s32.totalorder %v28_v6, %v768_v4  ;;  %vm47_vm5 = vcmp.le.s32.totalorder %v29_v7, %v768_v4  ;;  %v34_v13 = vadd.s32 64, %v26_v3 }
   0x7   :  { %vm537_vm6 = vmpackc.low %vm45_vm3, %vm44_vm2  ;;  %vm48_vm8 = vcmp.le.s32.totalorder %v30_v8, %v768_v4  ;;  %vm49_vm9 = vcmp.le.s32.totalorder %v31_v9, %v768_v4  ;;  %vm50_vm11 = vcmp.le.s32.totalorder %v32_v11, %v768_v4  ;;  %vm51_vm12 = vcmp.le.s32.totalorder %v33_v12, %v768_v4 }
   0x8   :  { %605 = vmatpush3.bf16.msk.msra.mxu1 %vm537_vm6, %v708_v10  ;;  %641 = vmatpush3.bf16.msk.msra.mxu0 %vm537_vm6, %v708_v10  ;;  %vm539_vm7 = vmpackc.low %vm47_vm5, %vm46_vm4  ;;  %v35_v14 = vadd.s32 72, %v26_v3  ;;  %vm52_vm14 = vcmp.le.s32.totalorder %v34_v13, %v768_v4  ;;  %v36_v15 = vadd.s32 80, %v26_v3  ;;  %v37_v16 = vadd.s32 88, %v26_v3  ;;  %v217_v21 = vld [vmem:[#allocation4 + $0x8] sm:$0xff]  ;;  %v216_v23 = vld [vmem:[#allocation4] sm:$0xff] }
   0x9   :  { %606 = vmatprep.subr.bf16.mxu1 %v705_v2  ;;  %642 = vmatprep.subr.bf16.mxu0 %v705_v2  ;;  %vm541_vm10 = vmpackc.low %vm49_vm9, %vm48_vm8  ;;  %v38_v17 = vadd.s32 96, %v26_v3  ;;  %v39_v18 = vadd.s32 104, %v26_v3  ;;  %v40_v19 = vadd.s32 112, %v26_v3  ;;  %v41_v20 = vadd.s32 120, %v26_v3  ;;  %v218_v24 = vld [vmem:[#allocation4 + $0x10] sm:$0xff]  ;;  %v219_v26 = vld [vmem:[#allocation4 + $0x18] sm:$0xff] }
   0xa   :  { %vm543_vm13 = vmpackc.low %vm51_vm12, %vm50_vm11  ;;  %vm53_vm15 = vcmp.le.s32.totalorder %v35_v14, %v768_v4  ;;  %vm54_vm3 = vcmp.le.s32.totalorder %v36_v15, %v768_v4  ;;  %vm55_vm4 = vcmp.le.s32.totalorder %v37_v16, %v768_v4  ;;  %304 = vperm.xlu1 %702, %v217_v21   ;;  %299 = vperm.xlu0 %701, %v216_v23   ;;  %v220_v25 = vld [vmem:[#allocation4 + $0x20] sm:$0xff]  ;;  %v221_v28 = vld [vmem:[#allocation4 + $0x28] sm:$0xff]  ;;  %vm125_vm12 = vcmp.eq.s32.totalorder %v768_v4, 0 }
   0xb   :  { %vm545_vm2 = vmpackc.low %vm53_vm15, %vm52_vm14  ;;  %vm56_vm6 = vcmp.le.s32.totalorder %v38_v17, %v768_v4  ;;  %vm58_vm9 = vcmp.le.s32.totalorder %v40_v19, %v768_v4  ;;  %v222_v27 = vld [vmem:[#allocation4 + $0x30] sm:$0xff]  ;;  %v223_v30 = vld [vmem:[#allocation4 + $0x38] sm:$0xff] }
   0xc   :  { %607 = vmatpush3.bf16.msk.msra.mxu1 %vm539_vm7, %v708_v10  ;;  %643 = vmatpush3.bf16.msk.msra.mxu0 %vm539_vm7, %v708_v10  ;;  %vm547_vm5 = vmpackc.low %vm55_vm4, %vm54_vm3  ;;  %vm57_vm7 = vcmp.le.s32.totalorder %v39_v18, %v768_v4  ;;  %v224_v29 = vld [vmem:[#allocation4 + $0x40] sm:$0xff]  ;;  %v126_v31 = vld [vmem:[#allocation5] sm:$0xff]  ;;  %vm153_vm3 = vcmp.eq.s32.totalorder %v19_v32, 1  ;;  %vm159_vm4 = vcmp.eq.s32.totalorder %v19_v32, 2 }
   0xd   :  { %608 = vmatprep.subr.bf16.mxu1 %v705_v2  ;;  %644 = vmatprep.subr.bf16.mxu0 %v705_v2  ;;  %vm549_vm8 = vmpackc.low %vm57_vm7, %vm56_vm6  ;;  %v137_v33 = vld [vmem:[#allocation6] sm:$0xff]  ;;  %v525_v47 = vsel %vm153_vm3, 1.0, %v705_v2  ;;  %v526_v48 = vsel %vm159_vm4, 1.0, %v705_v2  ;;  %vm711_vm6 = vmmov 1  }
   0xe   :  { %309 = vperm.xlu1 %702, %v218_v24   ;;  %319 = vperm.xlu0 %701, %v220_v25   ;;  %vm553_vm14 = vmneg %vm125_vm12  ;;  %v196_v51 = vsub.f32 %v525_v47, %v525_v47  ;;  %v197_v52 = vsub.f32 %v526_v48, %v526_v48  ;;  %v157_v56 = vmul.f32 %v525_v47, %v20_v42 }
   0xf   :  { %v163_v57 = vmul.f32 %v526_v48, %v20_v42 }
  0x10   :  { %609 = vmatpush3.bf16.msk.msra.mxu1 %vm541_vm10, %v708_v10  ;;  %645 = vmatpush3.bf16.msk.msra.mxu0 %vm541_vm10, %v708_v10  ;;  %vm59_vm10 = vcmp.le.s32.totalorder %v41_v20, %v768_v4  ;;  %v204_v54 = vpack.c.bf16 %v197_v52, %v196_v51 }
  0x11   :  { %610 = vmatprep.subr.bf16.mxu1 %v705_v2  ;;  %646 = vmatprep.subr.bf16.mxu0 %v705_v2  ;;  %vm551_vm11 = vmpackc.low %vm59_vm10, %vm58_vm9  ;;  %v183_v61 = vpack.c.bf16 %v163_v57, %v157_v56 }
  0x12   :  { %314 = vperm.xlu1 %702, %v219_v26   ;;  %329 = vperm.xlu0 %701, %v222_v27   ;;  %v528_v27 = vld [vmem:[%s925_s3] ss:$0 sm:$0xff] }
  0x13   :  { %v191_v63 = vunpack.c.l.bf16 %v183_v61  ;;  %v192_v0 = vunpack.c.h.bf16 %v183_v61 }
  0x14   :  { %611 = vmatpush3.bf16.msk.msra.mxu1 %vm543_vm13, %v708_v10  ;;  %647 = vmatpush3.bf16.msk.msra.mxu0 %vm543_vm13, %v708_v10  ;;  %vm147_vm13 = vcmp.eq.s32.totalorder %v19_v32, 0 }
  0x15   :  { %612 = vmatprep.subr.bf16.mxu1 %v705_v2  ;;  %648 = vmatprep.subr.bf16.mxu0 %v705_v2  ;;  %v524_v37 = vsel %vm147_vm13, 1.0, %v705_v2  ;;  %vm554_vm15 = vmpackc.low %vm147_vm13, %vm553_vm14  ;;  %v200_v5 = vsub.f32 %v157_v56, %v191_v63  ;;  %v201_v6 = vsub.f32 %v163_v57, %v192_v0 }
  0x16   :  { %324 = vperm.xlu1 %702, %v221_v28   ;;  %339 = vperm.xlu0 %701, %v224_v29   ;;  %v195_v44 = vsub.f32 %v524_v37, %v524_v37  ;;  %v151_v45 = vmul.f32 %v524_v37, %v20_v42 }
  0x17   :  { %v206_v8 = vpack.c.bf16 %v201_v6, %v200_v5 }
  0x18   :  { %613 = vmatpush3.bf16.msk.msra.mxu1 %vm545_vm2, %v708_v10  ;;  %649 = vmatpush3.bf16.msk.msra.mxu0 %vm545_vm2, %v708_v10  ;;  %vm165_vm2 = vcmp.eq.s32.totalorder %v19_v32, 3  ;;  %v560_v58 = vpack.c.bf16 %v151_v45, %v710_v39 }
  0x19   :  { %614 = vmatprep.subr.bf16.mxu1 %v705_v2  ;;  %650 = vmatprep.subr.bf16.mxu0 %v705_v2  ;;  %v527_v49 = vsel %vm165_vm2, 1.0, %v705_v2  ;;  %vm559_vm7 = vmpackc.low %vm711_vm6, %vm165_vm2 }
  0x1a   :  { %334 = vperm.xlu1 %702, %v223_v30   ;;  %v182_v53 = vpack.c.bf16 %v151_v45, %v527_v49  ;;  %v198_v59 = vsub.f32 %v527_v49, %v527_v49  ;;  %v169_v3 = vmul.f32 %v527_v49, %v20_v42 }
  0x1c   :  { %615 = vmatpush3.bf16.msk.msra.mxu1 %vm547_vm5, %v708_v10  ;;  %651 = vmatpush3.bf16.msk.msra.mxu0 %vm547_vm5, %v708_v10  ;;  %vm557_vm5 = vmpackc.low %vm159_vm4, %vm153_vm3  ;;  %v190_v55 = vunpack.c.h.bf16 %v182_v53  ;;  %v184_v7 = vpack.c.bf16 %v169_v3, %v169_v3 }
  0x1d   :  { %616 = vmatprep.subr.bf16.mxu1 %v705_v2  ;;  %652 = vmatprep.subr.bf16.mxu0 %v705_v2 }
  0x1e   :  { %129 = vperm.xlu1 %702, %v126_v31   ;;  %v199_v60 = vsub.f32 %v151_v45, %v190_v55  ;;  %v193_v9 = vunpack.c.l.bf16 %v184_v7 }
  0x20   :  { %617 = vmatpush3.bf16.msk.msra.mxu1 %vm549_vm8, %v708_v10  ;;  %653 = vmatpush3.bf16.msk.msra.mxu0 %vm549_vm8, %v708_v10  ;;  %v205_v62 = vpack.c.bf16 %v199_v60, %v198_v59 }
  0x21   :  { %618 = vmatprep.subr.bf16.mxu1 %v705_v2  ;;  %654 = vmatprep.subr.bf16.mxu0 %v705_v2 }
  0x24   :  { %619 = vmatpush3.bf16.msk.msra.mxu1 %vm551_vm11, %v708_v10  ;;  %655 = vmatpush3.bf16.msk.msra.mxu0 %vm551_vm11, %v708_v10 }
  0x74   :  { %v140_v34 = vpop.permute.xlu0 %139 }
  0x75   :  { %v143_v35 = vsel %vm108_vm0, %v137_v33, %v140_v34  ;;  %477 = vst.msk [vmem:[#allocation6] sm:$0xff] %vm108_vm0, %v140_v34 }
  0x76   :  { %v144_v36 = vsub.f32 %v740_v1, %v143_v35 }
  0x78   :  { %v145_v38 = vsel %vm125_vm12, 0.0, %v144_v36  ;;  %v555_v40 = vpack.c.bf16 %v710_v39, %v144_v36 }
  0x79   :  { %v180_v41 = vpack.c.bf16 %v524_v37, %v145_v38 }
  0x7a   :  { %621 = vmatmul.mubr.msk.bf16.vlgmr.msra.gmra.mrb[0].mxu1 %vm554_vm15, %v555_v40 }
  0x7b   :  { %624 = vmatprep.mubr.msk.bf16.mxu1 %vm707_vm1, %v705_v2  ;;  %v185_v43 = vunpack.c.l.bf16 %v180_v41 }
  0x7d   :  { %v194_v46 = vsub.f32 %v145_v38, %v185_v43 }
  0x7f   :  { %v203_v50 = vpack.c.bf16 %v195_v44, %v194_v46 }
  0x81   :  { %657 = vmatmul.mubr.bf16.vlgmr.msra.gmra.mrb[0].mxu0 %v203_v50 }
  0x82   :  { %625 = vmatmul.mubr.msk.bf16.gmra.mrb[4].mxu1 %vm557_vm5, %v708_v10  ;;  %660 = vmatprep.mubr.msk.bf16.mxu0 %vm707_vm1, %v705_v2  ;;  %v202_v10 = vsub.f32 %v169_v3, %v193_v9 }
  0x83   :  { %628 = vmatprep.mubr.msk.bf16.mxu1 %vm707_vm1, %v705_v2 }
  0x84   :  { %v207_v11 = vpack.c.bf16 %v202_v10, %v202_v10 }
  0x89   :  { %661 = vmatmul.mubr.bf16.gmra.mrb[4].mxu0 %v204_v54  ;;  %v305_v12 = vpop.permute.xlu1 %304  ;;  %v300_v23 = vpop.permute.xlu0 %299 }
  0x8a   :  { %629 = vmatmul.mubr.msk.bf16.gmra.mrb[8].mxu1 %vm559_vm7, %v560_v58  ;;  %664 = vmatprep.mubr.msk.bf16.mxu0 %vm707_vm1, %v705_v2 }
  0x8b   :  { %632 = vmatprep.mubr.msk.bf16.mxu1 %vm707_vm1, %v705_v2 }
  0x8d   :  { %v310_v13 = vpop.permute.xlu1 %309  ;;  %v320_v51 = vpop.permute.xlu0 %319 }
  0x91   :  { %665 = vmatmul.mubr.bf16.gmra.mrb[8].mxu0 %v205_v62  ;;  %v315_v14 = vpop.permute.xlu1 %314 }
  0x92   :  { %633 = vmatmul.mubr.bf16.gmra.mrb[12].mxu1 %v183_v61  ;;  %668 = vmatprep.mubr.msk.bf16.mxu0 %vm707_vm1, %v705_v2 }
  0x93   :  { %636 = vmatprep.mubr.msk.bf16.mxu1 %vm707_vm1, %v705_v2 }
  0x95   :  { %v325_v15 = vpop.permute.xlu1 %324 }
  0x99   :  { %669 = vmatmul.mubr.bf16.gmra.mrb[12].mxu0 %v206_v8  ;;  %v857_v16 = vpop.permute.xlu1 %334 }
  0x9a   :  { %637 = vmatmul.mubr.bf16.gmra.mrb[16].mxu1 %v184_v7  ;;  %672 = vmatprep.mubr.msk.bf16.mxu0 %vm707_vm1, %v705_v2  ;;  %v330_v7 = vpop.permute.xlu0 %329 }
  0x9d   :  { %v130_v17 = vpop.permute.xlu1 %129 }
  0x9e   :  { %v132_v18 = vsub.f32 %v740_v1, %v130_v17 }
  0xa0   :  { %v133_v19 = vsel %vm125_vm12, %v740_v1, %v132_v18 }
  0xa1   :  { %673 = vmatmul.mubr.bf16.gmra.mrb[16].mxu0 %v207_v11  ;;  %v134_v20 = vmax.f32 %v133_v19, 1e-06 }
  0xa3   :  { %703 = vrcp.f32 %v134_v20 }
  0xad   :  { %v866_v32 = vpop.eup %703 }
 0x14d   :  { %v259_v21 = vpop.f32.mrb[0].mxu1 }
 0x14e   :  { %v622_v22 = vpop.f32.mrb[1].mxu1  ;;  %v342_v25 = vadd.f32 %v300_v23, %v259_v21 }
 0x14f   :  { %v262_v2 = vpop.f32.mrb[2].mxu1 }
 0x150   :  { %v623_v24 = vpop.f32.mrb[3].mxu1  ;;  %v343_v28 = vadd.f32 %v305_v12, %v262_v2 }
 0x154   :  { %v385_v26 = vpop.f32.mrb[0].mxu0 }
 0x155   :  { %v423_v29 = vadd.f32 %v385_v26, %v342_v25  ;;  %v658_v30 = vpop.f32.mrb[1].mxu0  ;;  %v267_v31 = vpop.f32.mrb[4].mxu1 }
 0x156   :  { %v388_v1 = vpop.f32.mrb[2].mxu0  ;;  %v626_v4 = vpop.f32.mrb[5].mxu1  ;;  %v344_v39 = vadd.f32 %v310_v13, %v267_v31 }
 0x157   :  { %v485_v33 = vmul.f32 %v528_v27, %v423_v29  ;;  %v424_v34 = vadd.f32 %v388_v1, %v343_v28  ;;  %441 = vrot.lane.b32.xlu0 %v423_v29, %s706_s0  ;;  %v659_v35 = vpop.f32.mrb[3].mxu0  ;;  %v270_v36 = vpop.f32.mrb[6].mxu1 }
 0x158   :  { %v627_v37 = vpop.f32.mrb[7].mxu1  ;;  %v345_v41 = vadd.f32 %v315_v14, %v270_v36 }
 0x159   :  { %486 = vst [vmem:[%s926_s4] sm:$0xff] %v485_v33  ;;  %v487_v38 = vmul.f32 %v866_v32, %v424_v34  ;;  %443 = vrot.lane.b32.xlu1 %v424_v34, %s706_s0 }
 0x15b   :  { %529 = vst [vmem:[%s926_s4 + $0x8] sm:$0xff] %v487_v38 }
 0x15c   :  { %v393_v40 = vpop.f32.mrb[4].mxu0 }
 0x15d   :  { %v425_v42 = vadd.f32 %v393_v40, %v344_v39  ;;  %v662_v43 = vpop.f32.mrb[5].mxu0  ;;  %v275_v44 = vpop.f32.mrb[8].mxu1 }
 0x15e   :  { %v396_v45 = vpop.f32.mrb[6].mxu0  ;;  %v630_v46 = vpop.f32.mrb[9].mxu1  ;;  %v346_v54 = vadd.f32 %v320_v51, %v275_v44 }
 0x15f   :  { %v488_v47 = vmul.f32 %v866_v32, %v425_v42  ;;  %v426_v48 = vadd.f32 %v396_v45, %v345_v41  ;;  %445 = vrot.lane.b32.xlu0 %v425_v42, %s706_s0  ;;  %v663_v49 = vpop.f32.mrb[7].mxu0  ;;  %v278_v50 = vpop.f32.mrb[10].mxu1 }
 0x160   :  { %v631_v52 = vpop.f32.mrb[11].mxu1  ;;  %v347_v56 = vadd.f32 %v325_v15, %v278_v50 }
 0x161   :  { %530 = vst [vmem:[%s926_s4 + $0x10] sm:$0xff] %v488_v47  ;;  %v489_v53 = vmul.f32 %v866_v32, %v426_v48  ;;  %447 = vrot.lane.b32.xlu1 %v426_v48, %s706_s0 }
 0x163   :  { %531 = vst [vmem:[%s926_s4 + $0x18] sm:$0xff] %v489_v53 }
 0x164   :  { %v401_v55 = vpop.f32.mrb[8].mxu0 }
 0x165   :  { %v427_v57 = vadd.f32 %v401_v55, %v346_v54  ;;  %v283_v58 = vpop.f32.mrb[12].mxu1  ;;  %v666_v59 = vpop.f32.mrb[9].mxu0 }
 0x166   :  { %v634_v60 = vpop.f32.mrb[13].mxu1  ;;  %v404_v61 = vpop.f32.mrb[10].mxu0  ;;  %v348_v8 = vadd.f32 %v330_v7, %v283_v58 }
 0x167   :  { %v490_v62 = vmul.f32 %v866_v32, %v427_v57  ;;  %v428_v63 = vadd.f32 %v404_v61, %v347_v56  ;;  %v286_v0 = vpop.f32.mrb[14].mxu1  ;;  %449 = vrot.lane.b32.xlu0 %v427_v57, %s706_s0  ;;  %v667_v3 = vpop.f32.mrb[11].mxu0 }
 0x168   :  { %v635_v5 = vpop.f32.mrb[15].mxu1  ;;  %v349_v10 = vadd.f32 %v857_v16, %v286_v0  ;;  %v340_v16 = vpop.permute.xlu0 %339 }
 0x169   :  { %532 = vst [vmem:[%s926_s4 + $0x20] sm:$0xff] %v490_v62  ;;  %v491_v6 = vmul.f32 %v866_v32, %v428_v63  ;;  %451 = vrot.lane.b32.xlu1 %v428_v63, %s706_s0 }
 0x16b   :  { %533 = vst [vmem:[%s926_s4 + $0x28] sm:$0xff] %v491_v6 }
 0x16c   :  { %v409_v9 = vpop.f32.mrb[12].mxu0 }
 0x16d   :  { %v429_v11 = vadd.f32 %v409_v9, %v348_v8  ;;  %v291_v12 = vpop.f32.mrb[16].mxu1  ;;  %v670_v13 = vpop.f32.mrb[13].mxu0 }
 0x16e   :  { %v412_v14 = vpop.f32.mrb[14].mxu0  ;;  %v638_v15 = vpop.f32.mrb[17].mxu1  ;;  %v350_v2 = vadd.f32 %v340_v16, %v291_v12 }
 0x16f   :  { %v492_v17 = vmul.f32 %v866_v32, %v429_v11  ;;  %v430_v18 = vadd.f32 %v412_v14, %v349_v10  ;;  %453 = vrot.lane.b32.xlu0 %v429_v11, %s706_s0  ;;  %v671_v19 = vpop.f32.mrb[15].mxu0  ;;  %v294_v20 = vpop.f32.mrb[18].mxu1 }
 0x170   :  { %v639_v21 = vpop.f32.mrb[19].mxu1 }
 0x171   :  { %534 = vst [vmem:[%s926_s4 + $0x30] sm:$0xff] %v492_v17  ;;  %v493_v22 = vmul.f32 %v866_v32, %v430_v18  ;;  %455 = vrot.lane.b32.xlu1 %v430_v18, %s706_s0 }
 0x173   :  { %535 = vst [vmem:[%s926_s4 + $0x38] sm:$0xff] %v493_v22 }
 0x174   :  { %v417_v23 = vpop.f32.mrb[16].mxu0 }
 0x175   :  { %v431_v24 = vadd.f32 %v417_v23, %v350_v2  ;;  %v674_v25 = vpop.f32.mrb[17].mxu0 }
 0x176   :  { %v420_v26 = vpop.f32.mrb[18].mxu0 }
 0x177   :  { %v494_v27 = vmul.f32 %v866_v32, %v431_v24  ;;  %457 = vrot.lane.b32.xlu0 %v431_v24, %s706_s0  ;;  %v675_v28 = vpop.f32.mrb[19].mxu0 }
 0x179   :  { %536 = vst [vmem:[%s926_s4 + $0x40] sm:$0xff] %v494_v27 }
 0x1c9   :  { %v442_v29 = vpop.permute.xlu0 %441 }
 0x1ca   :  { %468 = vst.msk [vmem:[#allocation4] sm:$0xff] %vm108_vm0, %v442_v29 }
 0x1cb   :  { %v444_v30 = vpop.permute.xlu1 %443 }
 0x1cc   :  { %469 = vst.msk [vmem:[#allocation4 + $0x8] sm:$0xff] %vm108_vm0, %v444_v30 }
 0x1d1   :  { %v446_v31 = vpop.permute.xlu0 %445 }
 0x1d2   :  { %470 = vst.msk [vmem:[#allocation4 + $0x10] sm:$0xff] %vm108_vm0, %v446_v31 }
 0x1d3   :  { %v448_v1 = vpop.permute.xlu1 %447 }
 0x1d4   :  { %471 = vst.msk [vmem:[#allocation4 + $0x18] sm:$0xff] %vm108_vm0, %v448_v1 }
 0x1d9   :  { %v450_v32 = vpop.permute.xlu0 %449 }
 0x1da   :  { %472 = vst.msk [vmem:[#allocation4 + $0x20] sm:$0xff] %vm108_vm0, %v450_v32 }
 0x1db   :  { %v452_v4 = vpop.permute.xlu1 %451 }
 0x1dc   :  { %473 = vst.msk [vmem:[#allocation4 + $0x28] sm:$0xff] %vm108_vm0, %v452_v4 }
 0x1e1   :  { %v454_v33 = vpop.permute.xlu0 %453 }
 0x1e2   :  { %474 = vst.msk [vmem:[#allocation4 + $0x30] sm:$0xff] %vm108_vm0, %v454_v33 }
 0x1e3   :  { %v456_v34 = vpop.permute.xlu1 %455 }
 0x1e4   :  { %475 = vst.msk [vmem:[#allocation4 + $0x38] sm:$0xff] %vm108_vm0, %v456_v34 }
 0x1e9   :  { %v458_v35 = vpop.permute.xlu0 %457 }
 0x1ea   :  { %476 = vst.msk [vmem:[#allocation4 + $0x40] sm:$0xff] %vm108_vm0, %v458_v35 }

</bundles_post_ra>
